<compile_context>
chip_gen: v7x
topology: tpu7x:2x2x1
jax: 0.10.0
libtpu: 0.0.40
codegen_flags: <defaults>
</compile_context>

<pallas_src>
import functools

import jax
import jax.numpy as jnp
from jax import lax
from jax.experimental import pallas as pl
from jax.experimental.pallas import tpu as pltpu


def _conv1x1(w, x, b):
    """1x1 conv as w (M, K) @ x (K, L) + b (M, 1) -> (M, L) f32.

    Tiny contractions (toy widths) stay on the VPU as unrolled broadcast-MACs;
    realistic MobileNetV2 widths (K >= 8 and M >= 8) route to the MXU with f32
    operands and f32 accumulation, riding the otherwise-idle vector-extended
    slot while the depthwise stage keeps the VALU/XLU busy.
    """
    M, K = w.shape
    if K >= 8 and M >= 8:
        # TODO(synk): optionally pre-cast weights/activations to bf16 in the
        # wrapper on v6e/v7x once validated at the target accuracy.
        return jnp.dot(w, x, preferred_element_type=jnp.float32) + b
    acc = w[:, 0:1] * x[0:1, :] + b          # init from tap 0 + bias
    for k in range(1, K):
        acc = acc + w[:, k:k + 1] * x[k:k + 1, :]
    return acc


def _mnv2_kernel(x_ref, m_ref, w1_ref, b1_ref, wdw_ref, bdw_ref, w3_ref,
                 b3_ref, o_ref, *, W, use_residual):
    """Whole (sub-)batch per grid step, channels on sublanes, batch*H*W on lanes.

    x_ref:   (Cin, L)     L = bn * H * W (bn images packed along lanes)
    m_ref:   (4, L)       int32 reflect masks: first_row/last_row/first_col/last_col
    w1_ref:  (mid, Cin)   expand 1x1 weight (BN scale folded in)
    b1_ref:  (mid, 1)
    wdw_ref: (mid, 9)     depthwise 3x3 taps, row-major (di, dj)
    bdw_ref: (mid, 1)
    w3_ref:  (Cout, mid)  pointwise 1x1 weight
    b3_ref:  (Cout, 1)
    o_ref:   (Cout, L)
    """
    x = x_ref[...]                                  # (Cin, L) f32
    L = x.shape[1]

    m = m_ref[...]                                  # (4, L) int32, DMA'd once
    first_row = m[0:1, :] != 0
    last_row = m[1:2, :] != 0
    first_col = m[2:3, :] != 0
    last_col = m[3:4, :] != 0

    # ---- expand: 1x1 conv (+ folded BN) + ReLU6 ---------------------------
    h1 = _conv1x1(w1_ref[...], x, b1_ref[...])      # (mid, L)
    h1 = jnp.clip(h1, 0.0, 6.0)

    # ---- depthwise: 3x3, stride=1, reflect padding, groups=mid ------------
    # TODO(synk): on v6e/v7x the depthwise stage could run in bf16 (packed
    # (16,128) vregs) to halve VALU work; kept in f32 here for accuracy and
    # v5e compatibility.
    up = pltpu.roll(h1, W, 1)           # h1[i-1, j] on interior rows
    down = pltpu.roll(h1, L - W, 1)     # h1[i+1, j] on interior rows
    r_m1 = jnp.where(first_row, down, up)    # row i-1 with reflect (-1 -> 1)
    r_p1 = jnp.where(last_row, up, down)     # row i+1 with reflect (H -> H-2)

    wdw = wdw_ref[...]                  # (mid, 9)
    bdw = bdw_ref[...]                  # (mid, 1)

    # Initialize accumulator from the center tap + bias (no zeros pass).
    acc = h1 * wdw[:, 4:5] + bdw
    for di, r in ((-1, r_m1), (0, h1), (1, r_p1)):
        left = pltpu.roll(r, 1, 1)          # r[i, j-1] on interior cols
        right = pltpu.roll(r, L - 1, 1)     # r[i, j+1] on interior cols
        c_m1 = jnp.where(first_col, right, left)   # col j-1 with reflect
        c_p1 = jnp.where(last_col, left, right)    # col j+1 with reflect
        k = (di + 1) * 3
        acc = acc + c_m1 * wdw[:, k:k + 1]
        acc = acc + c_p1 * wdw[:, k + 2:k + 3]
        if di != 0:
            acc = acc + r * wdw[:, k + 1:k + 2]
    h2 = jnp.clip(acc, 0.0, 6.0)                    # (mid, L)

    # ---- pointwise: 1x1 conv (+ folded BN), no activation -----------------
    h3 = _conv1x1(w3_ref[...], h2, b3_ref[...])     # (Cout, L)
    if use_residual:
        h3 = h3 + x

    o_ref[...] = h3.astype(o_ref.dtype)


@functools.partial(jax.jit, static_argnames=("stride", "batch_tile"))
def mobilenet_v2_block(x_nchw, w1, b1, wdw, bdw, w3, b3, stride=1,
                       batch_tile=None):
    """x_nchw: (N, Cin, H, W) float32, returns (N, Cout, H, W)."""
    # TODO(synk): stride=2 depthwise path (zero padding + spatial subsampling)
    # is not implemented; only stride=1 (the residual-capable case).
    assert stride == 1, "kernel implements stride=1 only"
    N, Cin, H, W = x_nchw.shape
    assert H >= 2 and W >= 2, "reflect padding requires H, W >= 2"
    mid = w1.shape[0]
    Cout = w3.shape[0]
    S = H * W
    use_residual = (stride == 1) and (Cin == Cout)

    # Images per grid step. Default: whole batch in one step (max amortization
    # of per-step overhead). On v7x, set batch_tile=ceil(N/2) to give both
    # TensorCores work when N >= 2.
    bn = N if batch_tile is None else max(1, min(int(batch_tile), N))
    L = bn * S

    # Fold batch into the lane axis: (N, Cin, H, W) -> (Cin, N*S).
    x = jnp.transpose(x_nchw.reshape(N, Cin, S), (1, 0, 2)).reshape(Cin, N * S)

    # Precomputed reflect-boundary lane masks (periodic per image, so one
    # (4, L) block serves every grid step via a constant index map).
    lane = jnp.arange(L, dtype=jnp.int32)
    row = (lane % S) // W
    col = lane % W
    masks = jnp.stack([row == 0, row == H - 1,
                       col == 0, col == W - 1]).astype(jnp.int32)   # (4, L)

    kernel = functools.partial(_mnv2_kernel, W=W, use_residual=use_residual)

    # TODO(synk): for production spatial sizes (e.g. H=W=56, mid>=144) add an
    # H-tile grid axis with a 1-row halo and budget VMEM against v7x's 64 MiB
    # (set vmem_limit_bytes explicitly); the whole-image blocks here are sized
    # for small feature maps.
    out = pl.pallas_call(
        kernel,
        out_shape=jax.ShapeDtypeStruct((Cout, N * S), x_nchw.dtype),
        grid=(pl.cdiv(N, bn),),
        in_specs=[
            pl.BlockSpec((Cin, L), lambda t: (0, t)),
            pl.BlockSpec((4, L), lambda t: (0, 0)),
            pl.BlockSpec((mid, Cin), lambda t: (0, 0)),
            pl.BlockSpec((mid, 1), lambda t: (0, 0)),
            pl.BlockSpec((mid, 9), lambda t: (0, 0)),
            pl.BlockSpec((mid, 1), lambda t: (0, 0)),
            pl.BlockSpec((Cout, mid), lambda t: (0, 0)),
            pl.BlockSpec((Cout, 1), lambda t: (0, 0)),
        ],
        out_specs=pl.BlockSpec((Cout, L), lambda t: (0, t)),
        compiler_params=pltpu.CompilerParams(
            dimension_semantics=("parallel",)),
    )(x, masks, w1, b1, wdw, bdw, w3, b3)

    out = jnp.transpose(out.reshape(Cout, N, S), (1, 0, 2))
    return out.reshape(N, Cout, H, W)


def init_params(key, in_channels, out_channels, expansion_factor=2, eps=1e-5):
    """Deterministic synthetic params; BN (eval-mode) folded into conv w/b.

    Weight layouts (out-channel leading, kernel-friendly):
      w1:  (mid, Cin)    b1:  (mid, 1)
      wdw: (mid, 9)      bdw: (mid, 1)     (3x3 taps flattened row-major)
      w3:  (Cout, mid)   b3:  (Cout, 1)
    """
    mid = int(in_channels * expansion_factor)

    def conv_bn(k, w_shape, cout):
        kw, kb, kg, kbe, km, kv = jax.random.split(k, 6)
        w = 0.2 * jax.random.normal(kw, w_shape, jnp.float32)
        b = 0.1 * jax.random.normal(kb, (cout,), jnp.float32)
        gamma = 1.0 + 0.1 * jax.random.normal(kg, (cout,), jnp.float32)
        beta = 0.1 * jax.random.normal(kbe, (cout,), jnp.float32)
        rmean = 0.1 * jax.random.normal(km, (cout,), jnp.float32)
        rvar = 1.0 + 0.1 * jnp.abs(jax.random.normal(kv, (cout,), jnp.float32))
        s = gamma / jnp.sqrt(rvar + eps)              # per-out-channel scale
        shift = beta + (b - rmean) * s                # per-out-channel shift
        return w * s[:, None], shift.reshape(cout, 1)

    k1, k2, k3 = jax.random.split(key, 3)
    w1, b1 = conv_bn(k1, (mid, in_channels), mid)                 # expand 1x1
    wdw, bdw = conv_bn(k2, (mid, 9), mid)                         # depthwise 3x3
    w3, b3 = conv_bn(k3, (out_channels, mid), out_channels)       # pointwise 1x1
    return w1, b1, wdw, bdw, w3, b3


def reference_forward(x, w1, b1, wdw, bdw, w3, b3, stride=1):
    """Pure-JAX reference (independent conv implementation) for verification."""
    N, Cin, H, W = x.shape
    mid = w1.shape[0]
    Cout = w3.shape[0]
    h1 = jnp.einsum('nchw,mc->nmhw', x, w1) + b1.reshape(1, mid, 1, 1)
    h1 = jnp.clip(h1, 0.0, 6.0)
    hp = jnp.pad(h1, ((0, 0), (0, 0), (1, 1), (1, 1)), mode='reflect')
    h2 = lax.conv_general_dilated(
        hp, wdw.reshape(mid, 1, 3, 3), window_strides=(stride, stride),
        padding='VALID', dimension_numbers=('NCHW', 'OIHW', 'NCHW'),
        feature_group_count=mid)
    h2 = jnp.clip(h2 + bdw.reshape(1, mid, 1, 1), 0.0, 6.0)
    h3 = jnp.einsum('nmhw,om->nohw', h2, w3) + b3.reshape(1, Cout, 1, 1)
    if stride == 1 and Cin == Cout:
        h3 = h3 + x
    return h3


if __name__ == "__main__":
    key = jax.random.PRNGKey(0)
    kx, kp, kx2, kp2 = jax.random.split(key, 4)

    # ---- toy config (exercises the VPU broadcast-MAC 1x1 path + residual) --
    N, Cin, H, W = 2, 4, 16, 16
    Cout, expansion, stride = 4, 2, 1
    x = jax.random.normal(kx, (N, Cin, H, W), jnp.float32)
    params = init_params(kp, Cin, Cout, expansion_factor=expansion)

    y = mobilenet_v2_block(x, *params, stride=stride)
    y = jax.block_until_ready(y)

    y_ref = reference_forward(x, *params, stride=stride)
    assert y.shape == (N, Cout, H, W), y.shape
    assert jnp.allclose(y, y_ref, atol=1e-4, rtol=1e-4), \
        float(jnp.max(jnp.abs(y - y_ref)))

    # ---- realistic-width config (exercises the MXU 1x1 path) --------------
    # Looser tolerance: the 1x1 matmuls run on the MXU (reference uses XLA's
    # own dot lowering), so allow bf16-pass level rounding differences.
    N2, Cin2, H2, W2 = 2, 16, 16, 16
    Cout2, expansion2 = 16, 6                      # mid = 96
    x2 = jax.random.normal(kx2, (N2, Cin2, H2, W2), jnp.float32)
    params2 = init_params(kp2, Cin2, Cout2, expansion_factor=expansion2)

    y2 = mobilenet_v2_block(x2, *params2, stride=1)
    y2 = jax.block_until_ready(y2)
    y2_ref = reference_forward(x2, *params2, stride=1)
    assert y2.shape == (N2, Cout2, H2, W2), y2.shape
    assert jnp.allclose(y2, y2_ref, atol=2e-2, rtol=2e-2), \
        float(jnp.max(jnp.abs(y2 - y2_ref)))

    print("KERNEL_OK")
</pallas_src>

<mosaic_0001>
module attributes {stable_mosaic.version = 11 : i64} {
  func.func @_mnv2_kernel(%arg0: i32, %arg1: memref<4x512xf32, #tpu.memory_space<vmem>>, %arg2: memref<4x512xi32, #tpu.memory_space<vmem>>, %arg3: memref<8x4xf32, #tpu.memory_space<vmem>>, %arg4: memref<8x1xf32, #tpu.memory_space<vmem>>, %arg5: memref<8x9xf32, #tpu.memory_space<vmem>>, %arg6: memref<8x1xf32, #tpu.memory_space<vmem>>, %arg7: memref<4x8xf32, #tpu.memory_space<vmem>>, %arg8: memref<4x1xf32, #tpu.memory_space<vmem>>, %arg9: memref<4x512xf32, #tpu.memory_space<vmem>>) attributes {dimension_semantics = [#tpu.dimension_semantics<parallel>], iteration_bounds = array<i64: 1>, scalar_prefetch = 0 : i64, scratch_operands = 0 : i64, tpu.core_type = #tpu.core_type<tc>, window_params = [{transform_indices = @transform_0, window_bounds = array<i64: 4, 512>}, {pipeline_mode = #tpu.pipeline_mode<synchronous>, transform_indices = @transform_1, window_bounds = array<i64: 4, 512>}, {pipeline_mode = #tpu.pipeline_mode<synchronous>, transform_indices = @transform_2, window_bounds = array<i64: 8, 4>}, {pipeline_mode = #tpu.pipeline_mode<synchronous>, transform_indices = @transform_3, window_bounds = array<i64: 8, 1>}, {pipeline_mode = #tpu.pipeline_mode<synchronous>, transform_indices = @transform_4, window_bounds = array<i64: 8, 9>}, {pipeline_mode = #tpu.pipeline_mode<synchronous>, transform_indices = @transform_5, window_bounds = array<i64: 8, 1>}, {pipeline_mode = #tpu.pipeline_mode<synchronous>, transform_indices = @transform_6, window_bounds = array<i64: 4, 8>}, {pipeline_mode = #tpu.pipeline_mode<synchronous>, transform_indices = @transform_7, window_bounds = array<i64: 4, 1>}, {transform_indices = @transform_8, window_bounds = array<i64: 4, 512>}]} {
    %c0 = arith.constant 0 : index
    %c0_0 = arith.constant 0 : index
    %0 = vector.load %arg1[%c0, %c0_0] : memref<4x512xf32, #tpu.memory_space<vmem>>, vector<4x512xf32>
    %c0_1 = arith.constant 0 : index
    %c0_2 = arith.constant 0 : index
    %1 = vector.load %arg2[%c0_1, %c0_2] : memref<4x512xi32, #tpu.memory_space<vmem>>, vector<4x512xi32>
    %2 = vector.extract_strided_slice %1 {offsets = [0, 0], sizes = [1, 512], strides = [1, 1]} : vector<4x512xi32> to vector<1x512xi32>
    %c0_i32 = arith.constant 0 : i32
    %3 = vector.broadcast %c0_i32 : i32 to vector<1x512xi32>
    %4 = arith.cmpi ne, %2, %3 : vector<1x512xi32>
    %5 = vector.extract_strided_slice %1 {offsets = [1, 0], sizes = [1, 512], strides = [1, 1]} : vector<4x512xi32> to vector<1x512xi32>
    %c0_i32_3 = arith.constant 0 : i32
    %6 = vector.broadcast %c0_i32_3 : i32 to vector<1x512xi32>
    %7 = arith.cmpi ne, %5, %6 : vector<1x512xi32>
    %8 = vector.extract_strided_slice %1 {offsets = [2, 0], sizes = [1, 512], strides = [1, 1]} : vector<4x512xi32> to vector<1x512xi32>
    %c0_i32_4 = arith.constant 0 : i32
    %9 = vector.broadcast %c0_i32_4 : i32 to vector<1x512xi32>
    %10 = arith.cmpi ne, %8, %9 : vector<1x512xi32>
    %11 = vector.extract_strided_slice %1 {offsets = [3, 0], sizes = [1, 512], strides = [1, 1]} : vector<4x512xi32> to vector<1x512xi32>
    %c0_i32_5 = arith.constant 0 : i32
    %12 = vector.broadcast %c0_i32_5 : i32 to vector<1x512xi32>
    %13 = arith.cmpi ne, %11, %12 : vector<1x512xi32>
    %c0_6 = arith.constant 0 : index
    %c0_7 = arith.constant 0 : index
    %14 = vector.load %arg3[%c0_6, %c0_7] : memref<8x4xf32, #tpu.memory_space<vmem>>, vector<8x4xf32>
    %c0_8 = arith.constant 0 : index
    %c0_9 = arith.constant 0 : index
    %15 = vector.load %arg4[%c0_8, %c0_9] : memref<8x1xf32, #tpu.memory_space<vmem>>, vector<8x1xf32>
    %16 = vector.extract_strided_slice %14 {offsets = [0, 0], sizes = [8, 1], strides = [1, 1]} : vector<8x4xf32> to vector<8x1xf32>
    %17 = vector.extract_strided_slice %0 {offsets = [0, 0], sizes = [1, 512], strides = [1, 1]} : vector<4x512xf32> to vector<1x512xf32>
    %18 = vector.broadcast %16 : vector<8x1xf32> to vector<8x512xf32>
    %19 = vector.broadcast %17 : vector<1x512xf32> to vector<8x512xf32>
    %20 = arith.mulf %18, %19 : vector<8x512xf32>
    %21 = vector.broadcast %15 : vector<8x1xf32> to vector<8x512xf32>
    %22 = arith.addf %20, %21 : vector<8x512xf32>
    %23 = vector.extract_strided_slice %14 {offsets = [0, 1], sizes = [8, 1], strides = [1, 1]} : vector<8x4xf32> to vector<8x1xf32>
    %24 = vector.extract_strided_slice %0 {offsets = [1, 0], sizes = [1, 512], strides = [1, 1]} : vector<4x512xf32> to vector<1x512xf32>
    %25 = vector.broadcast %23 : vector<8x1xf32> to vector<8x512xf32>
    %26 = vector.broadcast %24 : vector<1x512xf32> to vector<8x512xf32>
    %27 = arith.mulf %25, %26 : vector<8x512xf32>
    %28 = arith.addf %22, %27 : vector<8x512xf32>
    %29 = vector.extract_strided_slice %14 {offsets = [0, 2], sizes = [8, 1], strides = [1, 1]} : vector<8x4xf32> to vector<8x1xf32>
    %30 = vector.extract_strided_slice %0 {offsets = [2, 0], sizes = [1, 512], strides = [1, 1]} : vector<4x512xf32> to vector<1x512xf32>
    %31 = vector.broadcast %29 : vector<8x1xf32> to vector<8x512xf32>
    %32 = vector.broadcast %30 : vector<1x512xf32> to vector<8x512xf32>
    %33 = arith.mulf %31, %32 : vector<8x512xf32>
    %34 = arith.addf %28, %33 : vector<8x512xf32>
    %35 = vector.extract_strided_slice %14 {offsets = [0, 3], sizes = [8, 1], strides = [1, 1]} : vector<8x4xf32> to vector<8x1xf32>
    %36 = vector.extract_strided_slice %0 {offsets = [3, 0], sizes = [1, 512], strides = [1, 1]} : vector<4x512xf32> to vector<1x512xf32>
    %37 = vector.broadcast %35 : vector<8x1xf32> to vector<8x512xf32>
    %38 = vector.broadcast %36 : vector<1x512xf32> to vector<8x512xf32>
    %39 = arith.mulf %37, %38 : vector<8x512xf32>
    %40 = arith.addf %34, %39 : vector<8x512xf32>
    %cst = arith.constant 0.000000e+00 : f32
    %cst_10 = arith.constant 6.000000e+00 : f32
    %41 = vector.broadcast %cst : f32 to vector<8x512xf32>
    %42 = arith.maximumf %41, %40 : vector<8x512xf32>
    %43 = vector.broadcast %cst_10 : f32 to vector<8x512xf32>
    %44 = arith.minimumf %43, %42 : vector<8x512xf32>
    %c16_i32 = arith.constant 16 : i32
    %45 = tpu.dynamic_rotate %44 by %c16_i32 dim 1 : vector<8x512xf32>, i32 -> vector<8x512xf32>
    %c496_i32 = arith.constant 496 : i32
    %46 = tpu.dynamic_rotate %44 by %c496_i32 dim 1 : vector<8x512xf32>, i32 -> vector<8x512xf32>
    %47 = vector.shape_cast %4 : vector<1x512xi1> to vector<1x512xi1>
    %48 = vector.broadcast %47 : vector<1x512xi1> to vector<8x512xi1>
    %49 = arith.select %48, %46, %45 : vector<8x512xi1>, vector<8x512xf32>
    %50 = vector.shape_cast %7 : vector<1x512xi1> to vector<1x512xi1>
    %51 = vector.broadcast %50 : vector<1x512xi1> to vector<8x512xi1>
    %52 = arith.select %51, %45, %46 : vector<8x512xi1>, vector<8x512xf32>
    %c0_11 = arith.constant 0 : index
    %c0_12 = arith.constant 0 : index
    %53 = vector.load %arg5[%c0_11, %c0_12] : memref<8x9xf32, #tpu.memory_space<vmem>>, vector<8x9xf32>
    %c0_13 = arith.constant 0 : index
    %c0_14 = arith.constant 0 : index
    %54 = vector.load %arg6[%c0_13, %c0_14] : memref<8x1xf32, #tpu.memory_space<vmem>>, vector<8x1xf32>
    %55 = vector.extract_strided_slice %53 {offsets = [0, 4], sizes = [8, 1], strides = [1, 1]} : vector<8x9xf32> to vector<8x1xf32>
    %56 = vector.broadcast %55 : vector<8x1xf32> to vector<8x512xf32>
    %57 = arith.mulf %44, %56 : vector<8x512xf32>
    %58 = vector.broadcast %54 : vector<8x1xf32> to vector<8x512xf32>
    %59 = arith.addf %57, %58 : vector<8x512xf32>
    %c1_i32 = arith.constant 1 : i32
    %60 = tpu.dynamic_rotate %49 by %c1_i32 dim 1 : vector<8x512xf32>, i32 -> vector<8x512xf32>
    %c511_i32 = arith.constant 511 : i32
    %61 = tpu.dynamic_rotate %49 by %c511_i32 dim 1 : vector<8x512xf32>, i32 -> vector<8x512xf32>
    %62 = vector.shape_cast %10 : vector<1x512xi1> to vector<1x512xi1>
    %63 = vector.broadcast %62 : vector<1x512xi1> to vector<8x512xi1>
    %64 = arith.select %63, %61, %60 : vector<8x512xi1>, vector<8x512xf32>
    %65 = vector.shape_cast %13 : vector<1x512xi1> to vector<1x512xi1>
    %66 = vector.broadcast %65 : vector<1x512xi1> to vector<8x512xi1>
    %67 = arith.select %66, %60, %61 : vector<8x512xi1>, vector<8x512xf32>
    %68 = vector.extract_strided_slice %53 {offsets = [0, 0], sizes = [8, 1], strides = [1, 1]} : vector<8x9xf32> to vector<8x1xf32>
    %69 = vector.broadcast %68 : vector<8x1xf32> to vector<8x512xf32>
    %70 = arith.mulf %64, %69 : vector<8x512xf32>
    %71 = arith.addf %59, %70 : vector<8x512xf32>
    %72 = vector.extract_strided_slice %53 {offsets = [0, 2], sizes = [8, 1], strides = [1, 1]} : vector<8x9xf32> to vector<8x1xf32>
    %73 = vector.broadcast %72 : vector<8x1xf32> to vector<8x512xf32>
    %74 = arith.mulf %67, %73 : vector<8x512xf32>
    %75 = arith.addf %71, %74 : vector<8x512xf32>
    %76 = vector.extract_strided_slice %53 {offsets = [0, 1], sizes = [8, 1], strides = [1, 1]} : vector<8x9xf32> to vector<8x1xf32>
    %77 = vector.broadcast %76 : vector<8x1xf32> to vector<8x512xf32>
    %78 = arith.mulf %49, %77 : vector<8x512xf32>
    %79 = arith.addf %75, %78 : vector<8x512xf32>
    %c1_i32_15 = arith.constant 1 : i32
    %80 = tpu.dynamic_rotate %44 by %c1_i32_15 dim 1 : vector<8x512xf32>, i32 -> vector<8x512xf32>
    %c511_i32_16 = arith.constant 511 : i32
    %81 = tpu.dynamic_rotate %44 by %c511_i32_16 dim 1 : vector<8x512xf32>, i32 -> vector<8x512xf32>
    %82 = vector.shape_cast %10 : vector<1x512xi1> to vector<1x512xi1>
    %83 = vector.broadcast %82 : vector<1x512xi1> to vector<8x512xi1>
    %84 = arith.select %83, %81, %80 : vector<8x512xi1>, vector<8x512xf32>
    %85 = vector.shape_cast %13 : vector<1x512xi1> to vector<1x512xi1>
    %86 = vector.broadcast %85 : vector<1x512xi1> to vector<8x512xi1>
    %87 = arith.select %86, %80, %81 : vector<8x512xi1>, vector<8x512xf32>
    %88 = vector.extract_strided_slice %53 {offsets = [0, 3], sizes = [8, 1], strides = [1, 1]} : vector<8x9xf32> to vector<8x1xf32>
    %89 = vector.broadcast %88 : vector<8x1xf32> to vector<8x512xf32>
    %90 = arith.mulf %84, %89 : vector<8x512xf32>
    %91 = arith.addf %79, %90 : vector<8x512xf32>
    %92 = vector.extract_strided_slice %53 {offsets = [0, 5], sizes = [8, 1], strides = [1, 1]} : vector<8x9xf32> to vector<8x1xf32>
    %93 = vector.broadcast %92 : vector<8x1xf32> to vector<8x512xf32>
    %94 = arith.mulf %87, %93 : vector<8x512xf32>
    %95 = arith.addf %91, %94 : vector<8x512xf32>
    %c1_i32_17 = arith.constant 1 : i32
    %96 = tpu.dynamic_rotate %52 by %c1_i32_17 dim 1 : vector<8x512xf32>, i32 -> vector<8x512xf32>
    %c511_i32_18 = arith.constant 511 : i32
    %97 = tpu.dynamic_rotate %52 by %c511_i32_18 dim 1 : vector<8x512xf32>, i32 -> vector<8x512xf32>
    %98 = vector.shape_cast %10 : vector<1x512xi1> to vector<1x512xi1>
    %99 = vector.broadcast %98 : vector<1x512xi1> to vector<8x512xi1>
    %100 = arith.select %99, %97, %96 : vector<8x512xi1>, vector<8x512xf32>
    %101 = vector.shape_cast %13 : vector<1x512xi1> to vector<1x512xi1>
    %102 = vector.broadcast %101 : vector<1x512xi1> to vector<8x512xi1>
    %103 = arith.select %102, %96, %97 : vector<8x512xi1>, vector<8x512xf32>
    %104 = vector.extract_strided_slice %53 {offsets = [0, 6], sizes = [8, 1], strides = [1, 1]} : vector<8x9xf32> to vector<8x1xf32>
    %105 = vector.broadcast %104 : vector<8x1xf32> to vector<8x512xf32>
    %106 = arith.mulf %100, %105 : vector<8x512xf32>
    %107 = arith.addf %95, %106 : vector<8x512xf32>
    %108 = vector.extract_strided_slice %53 {offsets = [0, 8], sizes = [8, 1], strides = [1, 1]} : vector<8x9xf32> to vector<8x1xf32>
    %109 = vector.broadcast %108 : vector<8x1xf32> to vector<8x512xf32>
    %110 = arith.mulf %103, %109 : vector<8x512xf32>
    %111 = arith.addf %107, %110 : vector<8x512xf32>
    %112 = vector.extract_strided_slice %53 {offsets = [0, 7], sizes = [8, 1], strides = [1, 1]} : vector<8x9xf32> to vector<8x1xf32>
    %113 = vector.broadcast %112 : vector<8x1xf32> to vector<8x512xf32>
    %114 = arith.mulf %52, %113 : vector<8x512xf32>
    %115 = arith.addf %111, %114 : vector<8x512xf32>
    %cst_19 = arith.constant 0.000000e+00 : f32
    %cst_20 = arith.constant 6.000000e+00 : f32
    %116 = vector.broadcast %cst_19 : f32 to vector<8x512xf32>
    %117 = arith.maximumf %116, %115 : vector<8x512xf32>
    %118 = vector.broadcast %cst_20 : f32 to vector<8x512xf32>
    %119 = arith.minimumf %118, %117 : vector<8x512xf32>
    %c0_21 = arith.constant 0 : index
    %c0_22 = arith.constant 0 : index
    %120 = vector.load %arg7[%c0_21, %c0_22] : memref<4x8xf32, #tpu.memory_space<vmem>>, vector<4x8xf32>
    %c0_23 = arith.constant 0 : index
    %c0_24 = arith.constant 0 : index
    %121 = vector.load %arg8[%c0_23, %c0_24] : memref<4x1xf32, #tpu.memory_space<vmem>>, vector<4x1xf32>
    %122 = vector.extract_strided_slice %120 {offsets = [0, 0], sizes = [4, 1], strides = [1, 1]} : vector<4x8xf32> to vector<4x1xf32>
    %123 = vector.extract_strided_slice %119 {offsets = [0, 0], sizes = [1, 512], strides = [1, 1]} : vector<8x512xf32> to vector<1x512xf32>
    %124 = vector.broadcast %122 : vector<4x1xf32> to vector<4x512xf32>
    %125 = vector.broadcast %123 : vector<1x512xf32> to vector<4x512xf32>
    %126 = arith.mulf %124, %125 : vector<4x512xf32>
    %127 = vector.broadcast %121 : vector<4x1xf32> to vector<4x512xf32>
    %128 = arith.addf %126, %127 : vector<4x512xf32>
    %129 = vector.extract_strided_slice %120 {offsets = [0, 1], sizes = [4, 1], strides = [1, 1]} : vector<4x8xf32> to vector<4x1xf32>
    %130 = vector.extract_strided_slice %119 {offsets = [1, 0], sizes = [1, 512], strides = [1, 1]} : vector<8x512xf32> to vector<1x512xf32>
    %131 = vector.broadcast %129 : vector<4x1xf32> to vector<4x512xf32>
    %132 = vector.broadcast %130 : vector<1x512xf32> to vector<4x512xf32>
    %133 = arith.mulf %131, %132 : vector<4x512xf32>
    %134 = arith.addf %128, %133 : vector<4x512xf32>
    %135 = vector.extract_strided_slice %120 {offsets = [0, 2], sizes = [4, 1], strides = [1, 1]} : vector<4x8xf32> to vector<4x1xf32>
    %136 = vector.extract_strided_slice %119 {offsets = [2, 0], sizes = [1, 512], strides = [1, 1]} : vector<8x512xf32> to vector<1x512xf32>
    %137 = vector.broadcast %135 : vector<4x1xf32> to vector<4x512xf32>
    %138 = vector.broadcast %136 : vector<1x512xf32> to vector<4x512xf32>
    %139 = arith.mulf %137, %138 : vector<4x512xf32>
    %140 = arith.addf %134, %139 : vector<4x512xf32>
    %141 = vector.extract_strided_slice %120 {offsets = [0, 3], sizes = [4, 1], strides = [1, 1]} : vector<4x8xf32> to vector<4x1xf32>
    %142 = vector.extract_strided_slice %119 {offsets = [3, 0], sizes = [1, 512], strides = [1, 1]} : vector<8x512xf32> to vector<1x512xf32>
    %143 = vector.broadcast %141 : vector<4x1xf32> to vector<4x512xf32>
    %144 = vector.broadcast %142 : vector<1x512xf32> to vector<4x512xf32>
    %145 = arith.mulf %143, %144 : vector<4x512xf32>
    %146 = arith.addf %140, %145 : vector<4x512xf32>
    %147 = vector.extract_strided_slice %120 {offsets = [0, 4], sizes = [4, 1], strides = [1, 1]} : vector<4x8xf32> to vector<4x1xf32>
    %148 = vector.extract_strided_slice %119 {offsets = [4, 0], sizes = [1, 512], strides = [1, 1]} : vector<8x512xf32> to vector<1x512xf32>
    %149 = vector.broadcast %147 : vector<4x1xf32> to vector<4x512xf32>
    %150 = vector.broadcast %148 : vector<1x512xf32> to vector<4x512xf32>
    %151 = arith.mulf %149, %150 : vector<4x512xf32>
    %152 = arith.addf %146, %151 : vector<4x512xf32>
    %153 = vector.extract_strided_slice %120 {offsets = [0, 5], sizes = [4, 1], strides = [1, 1]} : vector<4x8xf32> to vector<4x1xf32>
    %154 = vector.extract_strided_slice %119 {offsets = [5, 0], sizes = [1, 512], strides = [1, 1]} : vector<8x512xf32> to vector<1x512xf32>
    %155 = vector.broadcast %153 : vector<4x1xf32> to vector<4x512xf32>
    %156 = vector.broadcast %154 : vector<1x512xf32> to vector<4x512xf32>
    %157 = arith.mulf %155, %156 : vector<4x512xf32>
    %158 = arith.addf %152, %157 : vector<4x512xf32>
    %159 = vector.extract_strided_slice %120 {offsets = [0, 6], sizes = [4, 1], strides = [1, 1]} : vector<4x8xf32> to vector<4x1xf32>
    %160 = vector.extract_strided_slice %119 {offsets = [6, 0], sizes = [1, 512], strides = [1, 1]} : vector<8x512xf32> to vector<1x512xf32>
    %161 = vector.broadcast %159 : vector<4x1xf32> to vector<4x512xf32>
    %162 = vector.broadcast %160 : vector<1x512xf32> to vector<4x512xf32>
    %163 = arith.mulf %161, %162 : vector<4x512xf32>
    %164 = arith.addf %158, %163 : vector<4x512xf32>
    %165 = vector.extract_strided_slice %120 {offsets = [0, 7], sizes = [4, 1], strides = [1, 1]} : vector<4x8xf32> to vector<4x1xf32>
    %166 = vector.extract_strided_slice %119 {offsets = [7, 0], sizes = [1, 512], strides = [1, 1]} : vector<8x512xf32> to vector<1x512xf32>
    %167 = vector.broadcast %165 : vector<4x1xf32> to vector<4x512xf32>
    %168 = vector.broadcast %166 : vector<1x512xf32> to vector<4x512xf32>
    %169 = arith.mulf %167, %168 : vector<4x512xf32>
    %170 = arith.addf %164, %169 : vector<4x512xf32>
    %171 = arith.addf %170, %0 : vector<4x512xf32>
    %c0_25 = arith.constant 0 : index
    %c0_26 = arith.constant 0 : index
    %172 = vector.load %arg9[%c0_25, %c0_26] : memref<4x512xf32, #tpu.memory_space<vmem>>, vector<4x512xf32>
    tpu.vector_store %arg9[%c0_25, %c0_26], %171 {strides = array<i32>} : memref<4x512xf32, #tpu.memory_space<vmem>>, vector<4x512xf32>,
    return
  }
  func.func @transform_0(%arg0: i32) -> (i32, i32) {
    %c0_i32 = arith.constant 0 : i32
    %c0_i32_0 = arith.constant 0 : i32
    return %c0_i32, %arg0 : i32, i32
  }
  func.func @transform_1(%arg0: i32) -> (i32, i32) {
    %c0_i32 = arith.constant 0 : i32
    %c0_i32_0 = arith.constant 0 : i32
    %c0_i32_1 = arith.constant 0 : i32
    return %c0_i32, %c0_i32_0 : i32, i32
  }
  func.func @transform_2(%arg0: i32) -> (i32, i32) {
    %c0_i32 = arith.constant 0 : i32
    %c0_i32_0 = arith.constant 0 : i32
    %c0_i32_1 = arith.constant 0 : i32
    return %c0_i32, %c0_i32_0 : i32, i32
  }
  func.func @transform_3(%arg0: i32) -> (i32, i32) {
    %c0_i32 = arith.constant 0 : i32
    %c0_i32_0 = arith.constant 0 : i32
    %c0_i32_1 = arith.constant 0 : i32
    return %c0_i32, %c0_i32_0 : i32, i32
  }
  func.func @transform_4(%arg0: i32) -> (i32, i32) {
    %c0_i32 = arith.constant 0 : i32
    %c0_i32_0 = arith.constant 0 : i32
    %c0_i32_1 = arith.constant 0 : i32
    return %c0_i32, %c0_i32_0 : i32, i32
  }
  func.func @transform_5(%arg0: i32) -> (i32, i32) {
    %c0_i32 = arith.constant 0 : i32
    %c0_i32_0 = arith.constant 0 : i32
    %c0_i32_1 = arith.constant 0 : i32
    return %c0_i32, %c0_i32_0 : i32, i32
  }
  func.func @transform_6(%arg0: i32) -> (i32, i32) {
    %c0_i32 = arith.constant 0 : i32
    %c0_i32_0 = arith.constant 0 : i32
    %c0_i32_1 = arith.constant 0 : i32
    return %c0_i32, %c0_i32_0 : i32, i32
  }
  func.func @transform_7(%arg0: i32) -> (i32, i32) {
    %c0_i32 = arith.constant 0 : i32
    %c0_i32_0 = arith.constant 0 : i32
    %c0_i32_1 = arith.constant 0 : i32
    return %c0_i32, %c0_i32_0 : i32, i32
  }
  func.func @transform_8(%arg0: i32) -> (i32, i32) {
    %c0_i32 = arith.constant 0 : i32
    %c0_i32_0 = arith.constant 0 : i32
    return %c0_i32, %arg0 : i32, i32
  }
}

</mosaic_0001>

<bundles_post_ra>
// kernel: mobilenet_v2_block.1
= control target key start
LH: loop header
LB: loop body
LE: loop exit
PB: predicated region body
PF: predicated region fallthrough
CT: control target
= control target key end

     0   :  { %v943_v0 = vmov 0   ;;  %v944_v1 = vmov 1   ;;  %v945_v4 = vmov 2   ;;  %v946_v5 = vmov 3   ;;  %s948_s11 = smov 16   ;;  %s949_s12 = smov 112   ;;  %s1597_s2 = inlined_call_operand.vmem [shape: f32[8,4], index: 2, kind: input, shape index: {}]   ;;  %s1598_s3 = inlined_call_operand.vmem [shape: f32[8,1], index: 3, kind: input, shape index: {}]   ;;  %s1599_s0 = inlined_call_operand.vmem [shape: f32[4,512], index: 0, kind: input, shape index: {}]   ;;  %s1600_s4 = inlined_call_operand.vmem [shape: f32[8,9], index: 4, kind: input, shape index: {}]   ;;  %s1601_s5 = inlined_call_operand.vmem [shape: f32[8,1], index: 5, kind: input, shape index: {}]   ;;  %s1602_s1 = inlined_call_operand.vmem [shape: s32[4,512], index: 1, kind: input, shape index: {}]   ;;  %s1603_s6 = inlined_call_operand.vmem [shape: f32[4,8], index: 6, kind: input, shape index: {}]   ;;  %s1604_s7 = inlined_call_operand.vmem [shape: f32[4,1], index: 7, kind: input, shape index: {}]   ;;  %s1605_s8 = inlined_call_operand.vmem [shape: f32[4,512], index: 8, kind: output, shape index: {}]  }
   0x1   :  { %916 = vset.pattern.permute.xlu0 %v943_v0  ;;  %917 = vset.pattern.permute.xlu1 %v944_v1  ;;  %v35_v2 = vld [vmem:[%s1597_s2] sm:$0xff]  ;;  %v947_v6 = vmov 4   ;;  %v44_v7 = vlaneseq  ;;  %v1028_v13 = vld [vmem:[%s1599_s0 + $0x8] sm:$0xff] }
   0x2   :  { %39 = vperm.xlu0 %916, %v35_v2   ;;  %94 = vperm.xlu1 %917, %v35_v2   ;;  %v36_v3 = vld [vmem:[%s1598_s3] sm:$0xff]  ;;  %1613 = vst [vmem:[#allocation3_spill] sm:$0xff] %v1028_v13 }
   0x3   :  { %v45_v8 = vshrl.u32 %v44_v7, 7  ;;  %v1023_v12 = vld [vmem:[%s1599_s0] sm:$0xff] }
   0x4   :  { %1612 = vst [vmem:[#allocation2_spill] sm:$0xff] %v1023_v12 }
   0x5   :  { %v1014_v9 = vsub.s32 0, %v45_v8  ;;  %v1016_v10 = vsub.s32 4, %v45_v8  ;;  %v1018_v11 = vsub.s32 1, %v45_v8  ;;  %v1030_v14 = vsub.s32 5, %v45_v8 }
   0x6   :  { %86 = vperm.xlu0 %916, %v36_v3   ;;  %918 = vset.pattern.permute.xlu1 %v945_v4  ;;  %v1032_v15 = vsub.s32 2, %v45_v8  ;;  %v1034_v16 = vsub.s32 6, %v45_v8  ;;  %v1036_v17 = vsub.s32 3, %v45_v8  ;;  %v1038_v18 = vsub.s32 7, %v45_v8 }
   0x7   :  { %142 = vperm.xlu1 %918, %v35_v2   ;;  %v47_v19 = vrot.slane %v1023_v12, %v1014_v9  ;;  %v51_v20 = vrot.slane %v1023_v12, %v1016_v10  ;;  %v55_v21 = vrot.slane %v1028_v13, %v1014_v9  ;;  %v59_v22 = vrot.slane %v1028_v13, %v1016_v10 }
   0x8   :  { %1614 = vst [vmem:[#allocation4_spill] sm:$0xff] %v1034_v16  ;;  %1615 = vst [vmem:[#allocation5_spill] sm:$0xff] %v1038_v18  ;;  %v100_v23 = vrot.slane %v1023_v12, %v1018_v11  ;;  %v104_v24 = vrot.slane %v1023_v12, %v1030_v14  ;;  %v108_v25 = vrot.slane %v1028_v13, %v1018_v11 }
   0x9   :  { %v112_v26 = vrot.slane %v1028_v13, %v1030_v14  ;;  %v148_v27 = vrot.slane %v1023_v12, %v1032_v15  ;;  %v152_v28 = vrot.slane %v1023_v12, %v1034_v16  ;;  %v156_v29 = vrot.slane %v1028_v13, %v1032_v15 }
   0xa   :  { %919 = vset.pattern.permute.xlu0 %v946_v5  ;;  %v160_v30 = vrot.slane %v1028_v13, %v1034_v16  ;;  %v196_v31 = vrot.slane %v1023_v12, %v1036_v17  ;;  %v200_v32 = vrot.slane %v1023_v12, %v1038_v18  ;;  %v204_v33 = vrot.slane %v1028_v13, %v1036_v17 }
   0xb   :  { %190 = vperm.xlu0 %919, %v35_v2   ;;  %921 = vset.pattern.permute.xlu1 %v943_v0  ;;  %v67_v34 = vrot.slane %v47_v19, %v1014_v9  ;;  %v71_v35 = vrot.slane %v51_v20, %v1014_v9  ;;  %v75_v36 = vrot.slane %v55_v21, %v1014_v9 }
   0xc   :  { %v79_v37 = vrot.slane %v59_v22, %v1014_v9  ;;  %v120_v40 = vrot.slane %v100_v23, %v1018_v11  ;;  %v124_v41 = vrot.slane %v104_v24, %v1018_v11  ;;  %v128_v42 = vrot.slane %v108_v25, %v1018_v11 }
   0xd   :  { %v132_v43 = vrot.slane %v112_v26, %v1018_v11  ;;  %v168_v44 = vrot.slane %v148_v27, %v1032_v15  ;;  %v172_v45 = vrot.slane %v152_v28, %v1032_v15  ;;  %v176_v46 = vrot.slane %v156_v29, %v1032_v15 }
   0xe   :  { %v208_v47 = vrot.slane %v1028_v13, %v1038_v18  ;;  %v180_v48 = vrot.slane %v160_v30, %v1032_v15  ;;  %v216_v49 = vrot.slane %v196_v31, %v1036_v17  ;;  %v220_v50 = vrot.slane %v200_v32, %v1036_v17 }
   0xf   :  { %920 = vset.pattern.permute.xlu0 %v947_v6  ;;  %v224_v51 = vrot.slane %v204_v33, %v1036_v17 }
  0x10   :  { %v228_v26 = vrot.slane %v208_v47, %v1036_v17 }
  0x81   :  { %v40_v38 = vpop.permute.xlu0 %39  ;;  %v95_v39 = vpop.permute.xlu1 %94 }
  0x82   :  { %v80_v52 = vmul.f32 %v67_v34, %v40_v38  ;;  %v81_v53 = vmul.f32 %v71_v35, %v40_v38  ;;  %v82_v54 = vmul.f32 %v75_v36, %v40_v38  ;;  %v83_v55 = vmul.f32 %v79_v37, %v40_v38 }
  0x83   :  { %v133_v56 = vmul.f32 %v120_v40, %v95_v39  ;;  %v134_v57 = vmul.f32 %v124_v41, %v95_v39  ;;  %v135_v58 = vmul.f32 %v128_v42, %v95_v39  ;;  %v136_v59 = vmul.f32 %v132_v43, %v95_v39 }
  0x85   :  { %v87_v60 = vpop.permute.xlu0 %86 }
  0x86   :  { %v89_v61 = vadd.f32 %v87_v60, %v80_v52  ;;  %v90_v62 = vadd.f32 %v87_v60, %v81_v53  ;;  %v91_v63 = vadd.f32 %v87_v60, %v82_v54  ;;  %v92_v2 = vadd.f32 %v87_v60, %v83_v55  ;;  %v143_v3 = vpop.permute.xlu1 %142  ;;  %v31_v54 = vld [vmem:[%s1602_s1] sm:$0xff] }
  0x87   :  { %v181_v8 = vmul.f32 %v168_v44, %v143_v3  ;;  %v182_v19 = vmul.f32 %v172_v45, %v143_v3  ;;  %v183_v20 = vmul.f32 %v176_v46, %v143_v3  ;;  %v184_v21 = vmul.f32 %v180_v48, %v143_v3  ;;  %v355_v48 = vld [vmem:[%s1600_s4] sm:$0xff]  ;;  %s952_s4 = smov 1  }
  0x88   :  { %v137_v22 = vadd.f32 %v133_v56, %v89_v61  ;;  %v138_v23 = vadd.f32 %v134_v57, %v90_v62  ;;  %v139_v24 = vadd.f32 %v135_v58, %v91_v63  ;;  %v140_v25 = vadd.f32 %v136_v59, %v92_v2 }
  0x89   :  { %v953_v52 = vmov 6   ;;  %v955_v53 = vmov 8   ;;  %vm33_vm0 = vcmp.ne.s32.totalorder %v31_v54, 0  ;;  %v1145_v62 = vand.u32 127, %v44_v7 }
  0x8a   :  { %v185_v27 = vadd.f32 %v181_v8, %v137_v22  ;;  %v186_v28 = vadd.f32 %v182_v19, %v138_v23  ;;  %v187_v29 = vadd.f32 %v183_v20, %v139_v24  ;;  %v191_v30 = vpop.permute.xlu0 %190  ;;  %v188_v34 = vadd.f32 %v184_v21, %v140_v25  ;;  %v32_v25 = vld [vmem:[%s1602_s1 + $0x8] sm:$0xff] }
  0x8b   :  { %v229_v31 = vmul.f32 %v216_v49, %v191_v30  ;;  %v230_v32 = vmul.f32 %v220_v50, %v191_v30  ;;  %v231_v33 = vmul.f32 %v224_v51, %v191_v30  ;;  %v232_v35 = vmul.f32 %v228_v26, %v191_v30  ;;  %v356_v49 = vld [vmem:[%s1601_s5] sm:$0xff]  ;;  %s954_s5 = smov 127  }
  0x8c   :  { %v950_v50 = vmov 5   ;;  %v951_v51 = vmov 7   ;;  %v1138_v55 = vsel %vm33_vm0, 1, %v943_v0  ;;  %vm255_vm1 = vcmp.lt.s32.totalorder %v1145_v62, 16 }
  0x8d   :  { %v233_v36 = vadd.f32 %v229_v31, %v185_v27  ;;  %v234_v37 = vadd.f32 %v230_v32, %v186_v28  ;;  %v235_v38 = vadd.f32 %v231_v33, %v187_v29  ;;  %v236_v41 = vadd.f32 %v232_v35, %v188_v34 }
  0x8e   :  { %v278_v58 = vrot.slane %v1138_v55, %v1014_v9  ;;  %v282_v59 = vrot.slane %v1138_v55, %v1016_v10  ;;  %vm268_vm2 = vcmp.lt.s32.totalorder %v1145_v62, 112  ;;  %vm34_vm5 = vcmp.ne.s32.totalorder %v32_v25, 0 }
  0x8f   :  { %v237_v39 = vmax.f32 %v233_v36, 0.0  ;;  %v239_v40 = vmax.f32 %v235_v38, 0.0  ;;  %v238_v42 = vmax.f32 %v234_v37, 0.0  ;;  %v240_v45 = vmax.f32 %v236_v41, 0.0 }
  0x90   :  { %v294_v63 = vrot.slane %v278_v58, %v1014_v9  ;;  %v298_v2 = vrot.slane %v282_v59, %v1014_v9  ;;  %v1171_v26 = vsel %vm34_vm5, 1, %v943_v0  ;;  %v318_v41 = vrot.slane %v1138_v55, %v1018_v11 }
  0x91   :  { %v1088_v43 = vmin.f32 %v237_v39, 6.0  ;;  %v1090_v44 = vmin.f32 %v239_v40, 6.0  ;;  %v1094_v46 = vmin.f32 %v238_v42, 6.0  ;;  %v1098_v47 = vmin.f32 %v240_v45, 6.0 }
  0x92   :  { %vm307_vm3 = vcmp.eq.s32.totalorder %v294_v63, 1  ;;  %vm308_vm4 = vcmp.eq.s32.totalorder %v298_v2, 1  ;;  %v290_v27 = vrot.slane %v1171_v26, %v1016_v10  ;;  %v286_v28 = vrot.slane %v1171_v26, %v1014_v9 }
  0x93   :  { %249 = vrot.lane.b32.xlu0 %v1090_v44, %s948_s11  ;;  %245 = vrot.lane.b32.xlu1 %v1088_v43, %s948_s11  ;;  %v326_v40 = vrot.slane %v1171_v26, %v1018_v11  ;;  %v416_v25 = vrot.slane %v1171_v26, %v1034_v16  ;;  %vm383_vm12 = vcmp.lt.s32.totalorder %v1145_v62, 1  ;;  %vm396_vm13 = vcmp.lt.s32.totalorder %v1145_v62, 127 }
  0x94   :  { %v306_v29 = vrot.slane %v290_v27, %v1014_v9  ;;  %v302_v30 = vrot.slane %v286_v28, %v1014_v9  ;;  %v444_v27 = vrot.slane %v1138_v55, %v1036_v17  ;;  %v456_v28 = vrot.slane %v1171_v26, %v1038_v18 }
  0x96   :  { %vm310_vm6 = vcmp.eq.s32.totalorder %v306_v29, 1  ;;  %vm309_vm7 = vcmp.eq.s32.totalorder %v302_v30, 1 }
  0x97   :  { %260 = vrot.lane.b32.xlu0 %v1088_v43, %s949_s12  ;;  %247 = vrot.lane.b32.xlu1 %v1094_v46, %s948_s11 }
  0x9b   :  { %264 = vrot.lane.b32.xlu0 %v1090_v44, %s949_s12  ;;  %251 = vrot.lane.b32.xlu1 %v1098_v47, %s948_s11 }
  0x9f   :  { %359 = vperm.xlu0 %920, %v355_v48   ;;  %262 = vrot.lane.b32.xlu1 %v1094_v46, %s949_s12 }
  0xa3   :  { %925 = vset.pattern.permute.xlu0 %v950_v50  ;;  %368 = vperm.xlu1 %921, %v356_v49   ;;  %v334_v49 = vrot.slane %v318_v41, %v1018_v11  ;;  %v448_v41 = vrot.slane %v1138_v55, %v1038_v18 }
  0xa4   :  { %562 = vperm.xlu0 %925, %v355_v48  }
  0xa5   :  { %vm347_vm9 = vcmp.eq.s32.totalorder %v334_v49, 1 }
  0xa7   :  { %266 = vrot.lane.b32.xlu1 %v1098_v47, %s949_s12 }
  0xa8   :  { %928 = vset.pattern.permute.xlu0 %v951_v51  ;;  %922 = vset.pattern.permute.xlu1 %v945_v4 }
  0xa9   :  { %630 = vperm.xlu0 %928, %v355_v48  }
  0xab   :  { %494 = vperm.xlu1 %922, %v355_v48  }
  0xad   :  { %929 = vset.pattern.permute.xlu0 %v943_v0 }
  0xae   :  { %482 = vperm.xlu0 %929, %v355_v48  }
  0xaf   :  { %923 = vset.pattern.permute.xlu1 %v944_v1 }
  0xb0   :  { %506 = vperm.xlu1 %923, %v355_v48  }
  0xb2   :  { %519 = vrot.lane.b32.xlu0 %v1094_v46, %s952_s4 }
  0xb4   :  { %924 = vset.pattern.permute.xlu1 %v946_v5 }
  0xb5   :  { %550 = vperm.xlu1 %924, %v355_v48  }
  0xb6   :  { %523 = vrot.lane.b32.xlu0 %v1098_v47, %s952_s4 }
  0xb9   :  { %926 = vset.pattern.permute.xlu1 %v953_v52 }
  0xba   :  { %531 = vrot.lane.b32.xlu0 %v1094_v46, %s954_s5  ;;  %606 = vperm.xlu1 %926, %v355_v48  }
  0xbe   :  { %535 = vrot.lane.b32.xlu0 %v1098_v47, %s954_s5  ;;  %927 = vset.pattern.permute.xlu1 %v955_v53  ;;  %v322_v53 = vrot.slane %v1138_v55, %v1030_v14 }
  0xbf   :  { %618 = vperm.xlu1 %927, %v355_v48   ;;  %v342_v48 = vrot.slane %v326_v40, %v1018_v11  ;;  %v412_v40 = vrot.slane %v1171_v26, %v1032_v15 }
  0xc1   :  { %vm349_vm8 = vcmp.eq.s32.totalorder %v342_v48, 1  ;;  %v452_v48 = vrot.slane %v1171_v26, %v1036_v17 }
  0xc3   :  { %517 = vrot.lane.b32.xlu1 %v1088_v43, %s952_s4 }
  0xc4   :  { %930 = vset.pattern.permute.xlu1 %v943_v0 }
  0xc7   :  { %521 = vrot.lane.b32.xlu1 %v1090_v44, %s952_s4 }
  0xcb   :  { %529 = vrot.lane.b32.xlu1 %v1088_v43, %s954_s5 }
  0xcf   :  { %533 = vrot.lane.b32.xlu1 %v1090_v44, %s954_s5 }
 0x105   :  { %v250_v56 = vpop.permute.xlu0 %249  ;;  %v246_v57 = vpop.permute.xlu1 %245 }
 0x109   :  { %v248_v60 = vpop.permute.xlu1 %247  ;;  %v261_v61 = vpop.permute.xlu0 %260 }
 0x10a   :  { %v258_v20 = vsel %vm255_vm1, %v246_v57, %v248_v60  ;;  %v257_v34 = vsel %vm255_vm1, %v248_v60, %v250_v56 }
 0x10d   :  { %v252_v3 = vpop.permute.xlu1 %251  ;;  %v265_v8 = vpop.permute.xlu0 %264 }
 0x10e   :  { %v259_v7 = vsel %vm255_vm1, %v252_v3, %v246_v57  ;;  %v256_v35 = vsel %vm255_vm1, %v250_v56, %v252_v3  ;;  %v338_v56 = vrot.slane %v322_v53, %v1018_v11  ;;  %v330_v57 = vrot.slane %v1171_v26, %v1030_v14  ;;  %v650_v53 = vld [vmem:[%s1604_s7] sm:$0xf] }
 0x10f   :  { %v1313_v26 = vrot.slane %v448_v41, %v1036_v17 }
 0x110   :  { %vm348_vm10 = vcmp.eq.s32.totalorder %v338_v56, 1  ;;  %v346_v63 = vrot.slane %v330_v57, %v1018_v11  ;;  %v1316_v56 = vrot.slane %v452_v48, %v1036_v17 }
 0x111   :  { %v263_v19 = vpop.permute.xlu1 %262 }
 0x112   :  { %v270_v21 = vsel %vm268_vm2, %v263_v19, %v265_v8  ;;  %v271_v22 = vsel %vm268_vm2, %v261_v61, %v263_v19  ;;  %vm350_vm11 = vcmp.eq.s32.totalorder %v346_v63, 1  ;;  %vm475_vm5 = vcmp.eq.s32.totalorder %v1316_v56, 1 }
 0x113   :  { %v1159_v23 = vsel %vm307_vm3, %v271_v22, %v259_v7  ;;  %v1161_v24 = vsel %vm308_vm4, %v270_v21, %v258_v20  ;;  %v1230_v60 = vsel %vm347_vm9, %v259_v7, %v271_v22  ;;  %v1241_v3 = vsel %vm348_vm10, %v258_v20, %v270_v21  ;;  %v1260_v21 = vld [vmem:[%s1603_s6] sm:$0xf] }
 0x114   :  { %375 = vrot.lane.b32.xlu1 %v1159_v23, %s952_s4  ;;  %377 = vrot.lane.b32.xlu0 %v1161_v24, %s952_s4  ;;  %v404_v22 = vrot.slane %v1138_v55, %v1032_v15  ;;  %vm474_vm4 = vcmp.eq.s32.totalorder %v1313_v26, 1 }
 0x116   :  { %v1274_v30 = vrot.slane %v404_v22, %v1032_v15 }
 0x118   :  { %vm433_vm14 = vcmp.eq.s32.totalorder %v1274_v30, 1 }
 0x11e   :  { %v1179_v31 = vpop.permute.xlu0 %359 }
 0x122   :  { %v1181_v32 = vpop.permute.xlu1 %368 }
 0x123   :  { %v1183_v33 = vpop.permute.xlu0 %562 }
 0x126   :  { %v267_v0 = vpop.permute.xlu1 %266 }
 0x127   :  { %v269_v36 = vsel %vm268_vm2, %v265_v8, %v267_v0  ;;  %v272_v37 = vsel %vm268_vm2, %v267_v0, %v261_v61 }
 0x128   :  { %v1193_v38 = vsel %vm310_vm6, %v272_v37, %v256_v35  ;;  %v1195_v39 = vsel %vm309_vm7, %v269_v36, %v257_v34  ;;  %v1207_v45 = vpop.permute.xlu0 %630  ;;  %v1228_v59 = vsel %vm349_vm8, %v257_v34, %v269_v36  ;;  %v1249_v19 = vsel %vm350_vm11, %v256_v35, %v272_v37 }
 0x129   :  { %381 = vrot.lane.b32.xlu0 %v1193_v38, %s952_s4  ;;  %379 = vrot.lane.b32.xlu1 %v1195_v39, %s952_s4  ;;  %v1277_v34 = vrot.slane %v416_v25, %v1032_v15  ;;  %v1280_v35 = vrot.slane %v444_v27, %v1036_v17  ;;  %v1283_v36 = vrot.slane %v456_v28, %v1036_v17 }
 0x12a   :  { %v1205_v42 = vpop.permute.xlu1 %494  ;;  %v408_v37 = vrot.slane %v1138_v55, %v1034_v16  ;;  %v1310_v55 = vrot.slane %v412_v40, %v1032_v15  ;;  %v635_v56 = vmul.f32 %v1207_v45, %v1228_v59 }
 0x12b   :  { %vm436_vm15 = vcmp.eq.s32.totalorder %v1277_v34, 1  ;;  %vm473_vm0 = vcmp.eq.s32.totalorder %v1280_v35, 1  ;;  %vm476_vm1 = vcmp.eq.s32.totalorder %v1283_v36, 1  ;;  %v636_v36 = vmul.f32 %v1207_v45, %v1249_v19 }
 0x12c   :  { %vm435_vm3 = vcmp.eq.s32.totalorder %v1310_v55, 1 }
 0x12d   :  { %390 = vrot.lane.b32.xlu0 %v1161_v24, %s954_s5  ;;  %388 = vrot.lane.b32.xlu1 %v1159_v23, %s954_s5  ;;  %v1226_v58 = vpop.permute.xlu0 %482 }
 0x12f   :  { %v1217_v54 = vpop.permute.xlu1 %506 }
 0x131   :  { %394 = vrot.lane.b32.xlu0 %v1193_v38, %s954_s5  ;;  %392 = vrot.lane.b32.xlu1 %v1195_v39, %s954_s5  ;;  %v1239_v2 = vpop.permute.xlu0 %519 }
 0x134   :  { %v1232_v61 = vpop.permute.xlu1 %550 }
 0x135   :  { %577 = vrot.lane.b32.xlu0 %v1228_v59, %s952_s4  ;;  %573 = vrot.lane.b32.xlu1 %v1230_v60, %s952_s4  ;;  %v524_v7 = vpop.permute.xlu0 %523 }
 0x139   :  { %585 = vrot.lane.b32.xlu0 %v1230_v60, %s954_s5  ;;  %575 = vrot.lane.b32.xlu1 %v1241_v3, %s952_s4  ;;  %v1247_v8 = vpop.permute.xlu1 %606  ;;  %v532_v0 = vpop.permute.xlu0 %531 }
 0x13d   :  { %589 = vrot.lane.b32.xlu0 %v1228_v59, %s954_s5  ;;  %579 = vrot.lane.b32.xlu1 %v1249_v19, %s952_s4  ;;  %v536_v57 = vpop.permute.xlu0 %535 }
 0x13e   :  { %v1255_v20 = vpop.permute.xlu1 %618 }
 0x141   :  { %653 = vperm.xlu0 %929, %v1260_v21   ;;  %587 = vrot.lane.b32.xlu1 %v1241_v3, %s954_s5 }
 0x142   :  { %v518_v29 = vpop.permute.xlu1 %517 }
 0x143   :  { %v528_v22 = vsel %vm383_vm12, %v524_v7, %v518_v29  ;;  %v527_v48 = vsel %vm383_vm12, %v518_v29, %v1239_v2 }
 0x145   :  { %932 = vset.pattern.permute.xlu0 %v945_v4  ;;  %591 = vrot.lane.b32.xlu1 %v1249_v19, %s954_s5  ;;  %v1307_v4 = vrot.slane %v408_v37, %v1032_v15 }
 0x146   :  { %714 = vperm.xlu0 %932, %v1260_v21   ;;  %v522_v49 = vpop.permute.xlu1 %521 }
 0x147   :  { %v525_v25 = vsel %vm383_vm12, %v522_v49, %v524_v7  ;;  %vm434_vm2 = vcmp.eq.s32.totalorder %v1307_v4, 1 }
 0x149   :  { %678 = vperm.xlu1 %930, %v650_v53   ;;  %v526_v53 = vsel %vm383_vm12, %v1239_v2, %v522_v49 }
 0x14a   :  { %935 = vset.pattern.permute.xlu0 %v950_v50  ;;  %v530_v63 = vpop.permute.xlu1 %529 }
 0x14b   :  { %v539_v27 = vsel %vm396_vm13, %v530_v63, %v532_v0  ;;  %v540_v28 = vsel %vm396_vm13, %v536_v57, %v530_v63  ;;  %798 = vperm.xlu0 %935, %v1260_v21  }
 0x14c   :  { %v1330_v37 = vsel %vm433_vm14, %v539_v27, %v528_v22  ;;  %v1334_v50 = vsel %vm436_vm15, %v540_v28, %v525_v25  ;;  %v1338_v40 = vsel %vm473_vm0, %v528_v22, %v539_v27  ;;  %v1342_v7 = vsel %vm476_vm1, %v525_v25, %v540_v28 }
 0x14d   :  { %931 = vset.pattern.permute.xlu1 %v944_v1 }
 0x14e   :  { %686 = vperm.xlu1 %931, %v1260_v21   ;;  %v534_v41 = vpop.permute.xlu1 %533 }
 0x14f   :  { %v537_v1 = vsel %vm396_vm13, %v534_v41, %v536_v57  ;;  %v538_v63 = vsel %vm396_vm13, %v532_v0, %v534_v41  ;;  %938 = vset.pattern.permute.xlu0 %v951_v51 }
 0x150   :  { %v1363_v22 = vsel %vm434_vm2, %v538_v63, %v527_v48  ;;  %v1367_v25 = vsel %vm435_vm3, %v537_v1, %v526_v53  ;;  %v1371_v29 = vsel %vm474_vm4, %v527_v48, %v538_v63  ;;  %v1375_v2 = vsel %vm475_vm5, %v526_v53, %v537_v1 }
 0x151   :  { %v364_v48 = vmul.f32 %v1179_v31, %v1090_v44 }
 0x152   :  { %933 = vset.pattern.permute.xlu1 %v946_v5  ;;  %v362_v5 = vmul.f32 %v1179_v31, %v1088_v43 }
 0x153   :  { %742 = vperm.xlu1 %933, %v1260_v21  }
 0x157   :  { %934 = vset.pattern.permute.xlu1 %v947_v6  ;;  %v363_v6 = vmul.f32 %v1179_v31, %v1094_v46  ;;  %v371_v46 = vadd.f32 %v1181_v32, %v362_v5 }
 0x158   :  { %770 = vperm.xlu1 %934, %v1260_v21  }
 0x159   :  { %v372_v1 = vadd.f32 %v1181_v32, %v363_v6 }
 0x15c   :  { %936 = vset.pattern.permute.xlu1 %v953_v52  ;;  %v365_v52 = vmul.f32 %v1179_v31, %v1098_v47 }
 0x15d   :  { %826 = vperm.xlu1 %936, %v1260_v21  }
 0x15e   :  { %v374_v47 = vadd.f32 %v1181_v32, %v365_v52 }
 0x161   :  { %937 = vset.pattern.permute.xlu1 %v951_v51 }
 0x162   :  { %854 = vperm.xlu1 %937, %v1260_v21  }
 0x186   :  { %v378_v0 = vpop.permute.xlu0 %377  ;;  %v376_v49 = vpop.permute.xlu1 %375 }
 0x187   :  { %v386_v18 = vsel %vm383_vm12, %v376_v49, %v378_v0 }
 0x19b   :  { %v382_v57 = vpop.permute.xlu0 %381  ;;  %v380_v27 = vpop.permute.xlu1 %379 }
 0x19c   :  { %v387_v51 = vsel %vm383_vm12, %v382_v57, %v376_v49  ;;  %v384_v44 = vsel %vm383_vm12, %v380_v27, %v382_v57  ;;  %v385_v31 = vsel %vm383_vm12, %v378_v0, %v380_v27 }
 0x19f   :  { %v391_v28 = vpop.permute.xlu0 %390  ;;  %v389_v41 = vpop.permute.xlu1 %388 }
 0x1a0   :  { %v399_v21 = vsel %vm396_vm13, %v389_v41, %v391_v28 }
 0x1a1   :  { %v437_v43 = vsel %vm433_vm14, %v399_v21, %v387_v51  ;;  %v477_v53 = vsel %vm473_vm0, %v387_v51, %v399_v21 }
 0x1a2   :  { %v485_v63 = vmul.f32 %v1226_v58, %v437_v43  ;;  %v497_v13 = vmul.f32 %v1205_v42, %v477_v53 }
 0x1a3   :  { %v395_v51 = vpop.permute.xlu0 %394  ;;  %v393_v21 = vpop.permute.xlu1 %392 }
 0x1a4   :  { %v489_v5 = vadd.f32 %v485_v63, %v371_v46  ;;  %v400_v6 = vsel %vm396_vm13, %v395_v51, %v389_v41  ;;  %v397_v52 = vsel %vm396_vm13, %v393_v21, %v395_v51  ;;  %v398_v49 = vsel %vm396_vm13, %v391_v28, %v393_v21 }
 0x1a5   :  { %v440_v57 = vsel %vm436_vm15, %v400_v6, %v384_v44  ;;  %v480_v0 = vsel %vm476_vm1, %v384_v44, %v400_v6  ;;  %v438_v27 = vsel %vm434_vm2, %v398_v49, %v386_v18  ;;  %v439_v43 = vsel %vm435_vm3, %v397_v52, %v385_v31 }
 0x1a6   :  { %v509_v41 = vmul.f32 %v1217_v54, %v1159_v23  ;;  %v501_v53 = vadd.f32 %v497_v13, %v489_v5  ;;  %v488_v46 = vmul.f32 %v1226_v58, %v440_v57  ;;  %v478_v28 = vsel %vm474_vm4, %v386_v18, %v398_v49 }
 0x1a7   :  { %v373_v63 = vadd.f32 %v1181_v32, %v364_v48  ;;  %v479_v44 = vsel %vm475_vm5, %v385_v31, %v397_v52  ;;  %v486_v51 = vmul.f32 %v1226_v58, %v438_v27  ;;  %v487_v21 = vmul.f32 %v1226_v58, %v439_v43  ;;  %v578_v6 = vpop.permute.xlu0 %577  ;;  %v574_v12 = vpop.permute.xlu1 %573 }
 0x1a8   :  { %v553_v23 = vmul.f32 %v1232_v61, %v1330_v37  ;;  %v513_v13 = vadd.f32 %v509_v41, %v501_v53  ;;  %v492_v5 = vadd.f32 %v488_v46, %v374_v47  ;;  %v500_v57 = vmul.f32 %v1205_v42, %v480_v0 }
 0x1a9   :  { %v490_v16 = vadd.f32 %v486_v51, %v372_v1  ;;  %v491_v18 = vadd.f32 %v487_v21, %v373_v63  ;;  %v498_v32 = vmul.f32 %v1205_v42, %v478_v28  ;;  %v499_v48 = vmul.f32 %v1205_v42, %v479_v44 }
 0x1aa   :  { %v512_v31 = vmul.f32 %v1217_v54, %v1193_v38  ;;  %v565_v58 = vmul.f32 %v1183_v33, %v1338_v40  ;;  %v504_v52 = vadd.f32 %v500_v57, %v492_v5  ;;  %v557_v49 = vadd.f32 %v553_v23, %v513_v13 }
 0x1ab   :  { %v510_v37 = vmul.f32 %v1217_v54, %v1161_v24  ;;  %v511_v47 = vmul.f32 %v1217_v54, %v1195_v39  ;;  %v502_v1 = vadd.f32 %v498_v32, %v490_v16  ;;  %v503_v0 = vadd.f32 %v499_v48, %v491_v18  ;;  %v576_v27 = vpop.permute.xlu1 %575  ;;  %v586_v24 = vpop.permute.xlu0 %585 }
 0x1ac   :  { %v556_v42 = vmul.f32 %v1232_v61, %v1334_v50  ;;  %v516_v43 = vadd.f32 %v512_v31, %v504_v52  ;;  %v569_v41 = vadd.f32 %v565_v58, %v557_v49  ;;  %v554_v38 = vmul.f32 %v1232_v61, %v1363_v22 }
 0x1ad   :  { %v555_v40 = vmul.f32 %v1232_v61, %v1367_v25  ;;  %v514_v53 = vadd.f32 %v510_v37, %v502_v1  ;;  %v515_v46 = vadd.f32 %v511_v47, %v503_v0  ;;  %v568_v39 = vmul.f32 %v1183_v33, %v1342_v7 }
 0x1ae   :  { %v560_v16 = vadd.f32 %v556_v42, %v516_v43  ;;  %v566_v54 = vmul.f32 %v1183_v33, %v1371_v29  ;;  %v567_v50 = vmul.f32 %v1183_v33, %v1375_v2  ;;  %v583_v23 = vsel %vm383_vm12, %v574_v12, %v576_v27 }
 0x1af   :  { %v580_v28 = vpop.permute.xlu1 %579  ;;  %v558_v63 = vadd.f32 %v554_v38, %v514_v53  ;;  %v559_v44 = vadd.f32 %v555_v40, %v515_v46  ;;  %v590_v61 = vpop.permute.xlu0 %589  ;;  %v634_v18 = vmul.f32 %v1207_v45, %v1241_v3  ;;  %v582_v4 = vsel %vm383_vm12, %v576_v27, %v578_v6 }
 0x1b0   :  { %v572_v22 = vadd.f32 %v568_v39, %v560_v16  ;;  %v584_v7 = vsel %vm383_vm12, %v580_v28, %v574_v12  ;;  %v633_v12 = vmul.f32 %v1207_v45, %v1230_v60  ;;  %v581_v35 = vsel %vm383_vm12, %v578_v6, %v580_v28 }
 0x1b1   :  { %v570_v51 = vadd.f32 %v566_v54, %v558_v63  ;;  %v571_v21 = vadd.f32 %v567_v50, %v559_v44 }
 0x1b3   :  { %v588_v25 = vpop.permute.xlu1 %587 }
 0x1b4   :  { %v594_v29 = vsel %vm396_vm13, %v588_v25, %v590_v61  ;;  %v595_v33 = vsel %vm396_vm13, %v586_v24, %v588_v25 }
 0x1b5   :  { %v597_v2 = vsel %vm433_vm14, %v595_v33, %v584_v7  ;;  %v598_v13 = vsel %vm434_vm2, %v594_v29, %v583_v23  ;;  %v601_v5 = vsel %vm473_vm0, %v584_v7, %v595_v33  ;;  %v602_v57 = vsel %vm474_vm4, %v583_v23, %v594_v29 }
 0x1b6   :  { %v609_v32 = vmul.f32 %v1247_v8, %v597_v2  ;;  %v610_v30 = vmul.f32 %v1247_v8, %v598_v13  ;;  %v621_v48 = vmul.f32 %v1255_v20, %v601_v5  ;;  %v622_v26 = vmul.f32 %v1255_v20, %v602_v57 }
 0x1b7   :  { %v592_v31 = vpop.permute.xlu1 %591 }
 0x1b8   :  { %v613_v58 = vadd.f32 %v609_v32, %v569_v41  ;;  %v614_v60 = vadd.f32 %v610_v30, %v570_v51  ;;  %v593_v3 = vsel %vm396_vm13, %v590_v61, %v592_v31  ;;  %v596_v52 = vsel %vm396_vm13, %v592_v31, %v586_v24 }
 0x1b9   :  { %v599_v49 = vsel %vm435_vm3, %v593_v3, %v582_v4  ;;  %v600_v37 = vsel %vm436_vm15, %v596_v52, %v581_v35  ;;  %v603_v6 = vsel %vm475_vm5, %v582_v4, %v593_v3  ;;  %v604_v47 = vsel %vm476_vm1, %v581_v35, %v596_v52 }
 0x1ba   :  { %v625_v1 = vadd.f32 %v621_v48, %v613_v58  ;;  %v626_v0 = vadd.f32 %v622_v26, %v614_v60  ;;  %v611_v27 = vmul.f32 %v1247_v8, %v599_v49  ;;  %v612_v42 = vmul.f32 %v1247_v8, %v600_v37 }
 0x1bb   :  { %v623_v62 = vmul.f32 %v1255_v20, %v603_v6  ;;  %v624_v55 = vmul.f32 %v1255_v20, %v604_v47 }
 0x1bc   :  { %v637_v43 = vadd.f32 %v633_v12, %v625_v1  ;;  %v638_v41 = vadd.f32 %v634_v18, %v626_v0  ;;  %v615_v34 = vadd.f32 %v611_v27, %v571_v21  ;;  %v616_v38 = vadd.f32 %v612_v42, %v572_v22 }
 0x1be   :  { %v627_v40 = vadd.f32 %v623_v62, %v615_v34  ;;  %v628_v53 = vadd.f32 %v624_v55, %v616_v38  ;;  %v641_v46 = vmax.f32 %v637_v43, 0.0  ;;  %v642_v24 = vmax.f32 %v638_v41, 0.0 }
 0x1c0   :  { %v639_v39 = vadd.f32 %v635_v56, %v627_v40  ;;  %v640_v8 = vadd.f32 %v636_v36, %v628_v53  ;;  %v1509_v50 = vmin.f32 %v641_v46, 6.0  ;;  %v1511_v20 = vmin.f32 %v642_v24, 6.0  ;;  %v654_v59 = vpop.permute.xlu0 %653 }
 0x1c2   :  { %v643_v16 = vmax.f32 %v639_v39, 0.0  ;;  %v644_v54 = vmax.f32 %v640_v8, 0.0  ;;  %v659_v44 = vrot.slane %v1509_v50, %v1014_v9  ;;  %v663_v22 = vrot.slane %v1511_v20, %v1014_v9 }
 0x1c3   :  { %v720_v25 = vrot.slane %v1509_v50, %v1032_v15  ;;  %v724_v23 = vrot.slane %v1511_v20, %v1032_v15  ;;  %v696_v5 = vrot.slane %v1511_v20, %v1018_v11  ;;  %v752_v1 = vrot.slane %v1511_v20, %v1036_v17 }
 0x1c4   :  { %v1513_v28 = vmin.f32 %v643_v16, 6.0  ;;  %v1515_v63 = vmin.f32 %v644_v54, 6.0  ;;  %v672_v7 = vmul.f32 %v659_v44, %v654_v59  ;;  %v673_v29 = vmul.f32 %v663_v22, %v654_v59 }
 0x1c5   :  { %v715_v13 = vpop.permute.xlu0 %714  ;;  %v804_v40 = vrot.slane %v1509_v50, %v1030_v14  ;;  %v808_v53 = vrot.slane %v1511_v20, %v1030_v14  ;;  %v776_v39 = vrot.slane %v1509_v50, %v1016_v10  ;;  %v780_v8 = vrot.slane %v1511_v20, %v1016_v10 }
 0x1c6   :  { %v667_v45 = vrot.slane %v1513_v28, %v1014_v9  ;;  %v671_v19 = vrot.slane %v1515_v63, %v1014_v9  ;;  %v728_v33 = vrot.slane %v1513_v28, %v1032_v15  ;;  %v732_v2 = vrot.slane %v1515_v63, %v1032_v15 }
 0x1c7   :  { %v692_v9 = vrot.slane %v1509_v50, %v1018_v11  ;;  %v700_v57 = vrot.slane %v1513_v28, %v1018_v11  ;;  %v704_v12 = vrot.slane %v1515_v63, %v1018_v11  ;;  %v733_v58 = vmul.f32 %v720_v25, %v715_v13 }
 0x1c8   :  { %v679_v51 = vpop.permute.xlu1 %678  ;;  %v674_v21 = vmul.f32 %v667_v45, %v654_v59  ;;  %v675_v61 = vmul.f32 %v671_v19, %v654_v59  ;;  %v734_v60 = vmul.f32 %v724_v23, %v715_v13  ;;  %v735_v3 = vmul.f32 %v728_v33, %v715_v13 }
 0x1c9   :  { %v681_v18 = vadd.f32 %v679_v51, %v672_v7  ;;  %v682_v32 = vadd.f32 %v679_v51, %v673_v29  ;;  %v736_v52 = vmul.f32 %v732_v2, %v715_v13  ;;  %v748_v11 = vrot.slane %v1509_v50, %v1036_v17 }
 0x1ca   :  { %v683_v30 = vadd.f32 %v679_v51, %v674_v21  ;;  %v684_v4 = vadd.f32 %v679_v51, %v675_v61  ;;  %v756_v0 = vrot.slane %v1513_v28, %v1036_v17  ;;  %v760_v27 = vrot.slane %v1515_v63, %v1036_v17  ;;  %v799_v24 = vpop.permute.xlu0 %798 }
 0x1cb   :  { %v812_v46 = vrot.slane %v1513_v28, %v1030_v14  ;;  %v816_v17 = vrot.slane %v1515_v63, %v1030_v14  ;;  %v784_v16 = vrot.slane %v1513_v28, %v1016_v10  ;;  %v788_v54 = vrot.slane %v1515_v63, %v1016_v10 }
 0x1cc   :  { %v817_v25 = vmul.f32 %v804_v40, %v799_v24  ;;  %v818_v23 = vmul.f32 %v808_v53, %v799_v24 }
 0x1cd   :  { %v687_v35 = vpop.permute.xlu1 %686  ;;  %v819_v7 = vmul.f32 %v812_v46, %v799_v24  ;;  %v820_v29 = vmul.f32 %v816_v17, %v799_v24 }
 0x1ce   :  { %v705_v48 = vmul.f32 %v692_v9, %v687_v35  ;;  %v706_v15 = vmul.f32 %v696_v5, %v687_v35  ;;  %v707_v26 = vmul.f32 %v700_v57, %v687_v35  ;;  %v708_v31 = vmul.f32 %v704_v12, %v687_v35  ;;  %v1616_v5 = vld [vmem:[#allocation4_spill] sm:$0xff] }
 0x1cf   :  { %v832_v10 = vrot.slane %v1509_v50, %v1616_v5  ;;  %v836_v57 = vrot.slane %v1511_v20, %v1616_v5  ;;  %v840_v12 = vrot.slane %v1513_v28, %v1616_v5 }
 0x1d0   :  { %v709_v49 = vadd.f32 %v705_v48, %v681_v18  ;;  %v710_v37 = vadd.f32 %v706_v15, %v682_v32  ;;  %v711_v6 = vadd.f32 %v707_v26, %v683_v30  ;;  %v712_v47 = vadd.f32 %v708_v31, %v684_v4 }
 0x1d1   :  { %v844_v18 = vrot.slane %v1515_v63, %v1616_v5 }
 0x1d2   :  { %v737_v42 = vadd.f32 %v733_v58, %v709_v49  ;;  %v738_v62 = vadd.f32 %v734_v60, %v710_v37  ;;  %v739_v55 = vadd.f32 %v735_v3, %v711_v6  ;;  %v740_v43 = vadd.f32 %v736_v52, %v712_v47  ;;  %v743_v41 = vpop.permute.xlu1 %742  ;;  %v1617_v60 = vld [vmem:[#allocation2_spill] sm:$0xff]  ;;  %v1618_v52 = vld [vmem:[#allocation3_spill] sm:$0xff]  ;;  %v1619_v37 = vld [vmem:[#allocation5_spill] sm:$0xff] }
 0x1d3   :  { %v761_v34 = vmul.f32 %v748_v11, %v743_v41  ;;  %v762_v38 = vmul.f32 %v752_v1, %v743_v41  ;;  %v763_v56 = vmul.f32 %v756_v0, %v743_v41  ;;  %v764_v36 = vmul.f32 %v760_v27, %v743_v41 }
 0x1d4   :  { %v881_v3 = vcombine.high %v1617_v60, %v1617_v60  ;;  %v882_v49 = vcombine.high %v1618_v52, %v1618_v52  ;;  %v860_v6 = vrot.slane %v1509_v50, %v1619_v37  ;;  %v864_v47 = vrot.slane %v1511_v20, %v1619_v37  ;;  %v941_v20 = vld [vmem:[%s1599_s0] sm:$0xff] }
 0x1d5   :  { %v765_v59 = vadd.f32 %v761_v34, %v737_v42  ;;  %v766_v45 = vadd.f32 %v762_v38, %v738_v62  ;;  %v767_v19 = vadd.f32 %v763_v56, %v739_v55  ;;  %v768_v44 = vadd.f32 %v764_v36, %v740_v43 }
 0x1d6   :  { %v868_v11 = vrot.slane %v1513_v28, %v1619_v37  ;;  %v872_v1 = vrot.slane %v1515_v63, %v1619_v37  ;;  %v942_v63 = vld [vmem:[%s1599_s0 + $0x8] sm:$0xff] }
 0x1d7   :  { %v771_v22 = vpop.permute.xlu1 %770 }
 0x1d8   :  { %v789_v51 = vmul.f32 %v776_v39, %v771_v22  ;;  %v790_v14 = vmul.f32 %v780_v8, %v771_v22  ;;  %v791_v21 = vmul.f32 %v784_v16, %v771_v22  ;;  %v792_v61 = vmul.f32 %v788_v54, %v771_v22 }
 0x1da   :  { %v793_v33 = vadd.f32 %v789_v51, %v765_v59  ;;  %v794_v2 = vadd.f32 %v790_v14, %v766_v45  ;;  %v795_v13 = vadd.f32 %v791_v21, %v767_v19  ;;  %v796_v9 = vadd.f32 %v792_v61, %v768_v44 }
 0x1dc   :  { %v827_v32 = vpop.permute.xlu1 %826  ;;  %v821_v30 = vadd.f32 %v817_v25, %v793_v33  ;;  %v822_v4 = vadd.f32 %v818_v23, %v794_v2  ;;  %v823_v35 = vadd.f32 %v819_v7, %v795_v13  ;;  %v824_v48 = vadd.f32 %v820_v29, %v796_v9 }
 0x1dd   :  { %v845_v15 = vmul.f32 %v832_v10, %v827_v32  ;;  %v846_v26 = vmul.f32 %v836_v57, %v827_v32  ;;  %v847_v31 = vmul.f32 %v840_v12, %v827_v32  ;;  %v848_v58 = vmul.f32 %v844_v18, %v827_v32 }
 0x1df   :  { %v849_v0 = vadd.f32 %v845_v15, %v821_v30  ;;  %v850_v27 = vadd.f32 %v846_v26, %v822_v4  ;;  %v851_v42 = vadd.f32 %v847_v31, %v823_v35  ;;  %v852_v62 = vadd.f32 %v848_v58, %v824_v48 }
 0x1e1   :  { %v855_v55 = vpop.permute.xlu1 %854 }
 0x1e2   :  { %v873_v43 = vmul.f32 %v860_v6, %v855_v55  ;;  %v874_v41 = vmul.f32 %v864_v47, %v855_v55  ;;  %v875_v34 = vmul.f32 %v868_v11, %v855_v55  ;;  %v876_v38 = vmul.f32 %v872_v1, %v855_v55 }
 0x1e4   :  { %v877_v56 = vadd.f32 %v873_v43, %v849_v0  ;;  %v878_v50 = vadd.f32 %v874_v41, %v850_v27  ;;  %v879_v36 = vadd.f32 %v875_v34, %v851_v42  ;;  %v880_v40 = vadd.f32 %v876_v38, %v852_v62 }
 0x1e6   :  { %v885_v28 = vadd.f32 %v941_v20, %v877_v56  ;;  %v886_v53 = vadd.f32 %v881_v3, %v878_v50  ;;  %v887_v46 = vadd.f32 %v942_v63, %v879_v36  ;;  %v888_v17 = vadd.f32 %v882_v49, %v880_v40 }
 0x1e8   :  { %v893_v24 = vcombine.low %v885_v28, %v886_v53  ;;  %v894_v39 = vcombine.low %v887_v46, %v888_v17 }
 0x1ea   :  { %897 = vst [vmem:[%s1605_s8] sm:$0xff] %v893_v24  ;;  %898 = vst [vmem:[%s1605_s8 + $0x8] sm:$0xff] %v894_v39 }

</bundles_post_ra>
